<compile_context>
chip_gen: v5e
topology: v5e:2x2
jax: 0.10.0
libtpu: 0.0.40
codegen_flags: <defaults>
</compile_context>

<pallas_src>
import jax
import jax.numpy as jnp
from jax.experimental import pallas as pl
from jax.experimental.pallas import tpu as pltpu

LANES = 128
TM_MAX = 1024  # rows per block: 1024 * 128 * 4B = 512 KiB per f32 input block


def _round_up(x, m):
    return ((x + m - 1) // m) * m


def _make_kernel(tm, rows_total, need_mask, with_neg):
    """Build the accumulation kernel for a given static tile config."""

    def kernel(*refs):
        if with_neg:
            a_ref, p_ref, n_ref, out_ref = refs
        else:
            a_ref, p_ref, out_ref = refs

        i = pl.program_id(0)

        @pl.when(i == 0)
        def _():
            out_ref[...] = jnp.zeros_like(out_ref)

        a = a_ref[...].astype(jnp.float32)
        p = p_ref[...].astype(jnp.float32)
        d_ap = jnp.abs(a - p)
        if with_neg:
            n = n_ref[...].astype(jnp.float32)
            d_an = jnp.abs(a - n)

        if need_mask:
            row_ids = jax.lax.broadcasted_iota(jnp.int32, (tm, LANES), 0) + i * tm
            mask = row_ids < rows_total
            d_ap = jnp.where(mask, d_ap, 0.0)
            if with_neg:
                d_an = jnp.where(mask, d_an, 0.0)

        # (TM, 128) -> (TM//8, 8, 128), sum over the leading (non-layout) axis:
        # pure VPU adds into the resident lane-dense accumulator.
        out_ref[0] += d_ap.reshape(tm // 8, 8, LANES).sum(axis=0)
        if with_neg:
            out_ref[1] += d_an.reshape(tm // 8, 8, LANES).sum(axis=0)

    return kernel


def _pair_sums_impl(a2d, p2d, n2d):
    """a2d/p2d[/n2d]: (rows, 128) arrays (native dtype).

    Returns a (2,) or (1,) f32 vector: [sum|a-p| (, sum|a-n|)].
    """
    rows = a2d.shape[0]
    tm = min(TM_MAX, _round_up(rows, 8))
    nblocks = pl.cdiv(rows, tm)
    need_mask = (nblocks * tm != rows)
    with_neg = n2d is not None
    out_rows = 2 if with_neg else 1

    in_spec = pl.BlockSpec((tm, LANES), lambda i: (i, 0))
    out_spec = pl.BlockSpec((out_rows, 8, LANES), lambda i: (0, 0, 0))
    inputs = (a2d, p2d, n2d) if with_neg else (a2d, p2d)

    out = pl.pallas_call(
        _make_kernel(tm, rows, need_mask, with_neg),
        out_shape=jax.ShapeDtypeStruct((out_rows, 8, LANES), jnp.float32),
        grid_spec=pltpu.PrefetchScalarGridSpec(
            num_scalar_prefetch=0,
            grid=(nblocks,),
            in_specs=[in_spec] * len(inputs),
            out_specs=out_spec,
        ),
        compiler_params=pltpu.CompilerParams(
            dimension_semantics=("arbitrary",),
        ),
    )(*inputs)

    # Single final cross-lane/sublane reduce, done once in XLA (negligible).
    return jnp.sum(out, axis=(1, 2))


_pair_sums = jax.jit(_pair_sums_impl)


def _as_lanes(x):
    """Reshape any feature to (rows, 128) without a copy when numel % 128 == 0."""
    flat = jnp.ravel(x)
    n = flat.shape[0]
    pad = (-n) % LANES
    if pad:
        # Rare ragged tail: zero-pad a single partial lane row (|0-0| == 0,
        # so the accumulated sums stay exact; the mean divides by the true n).
        flat = jnp.pad(flat, (0, pad))
    return flat.reshape(-1, LANES), n


def l1_contrast_loss(a_feats, p_feats, n_feats, ablation=False):
    """Pallas implementation of L1ContrastLoss.forward (is_perm=False)."""
    loss = jnp.float32(0.0)
    for a, p, n in zip(a_feats, p_feats, n_feats):
        a2d, count = _as_lanes(a)
        p2d, _ = _as_lanes(p)
        if ablation:
            sums = _pair_sums(a2d, p2d, None)
            loss = loss + sums[0] / count
        else:
            n2d, _ = _as_lanes(n)
            sums = _pair_sums(a2d, p2d, n2d)
            d_ap = sums[0] / count
            d_an = sums[1] / count
            loss = loss + d_ap / (d_an + 1e-7)
    return loss


def l1_contrast_loss_ref(a_feats, p_feats, n_feats, ablation=False):
    """Pure-JAX reference matching the PyTorch module."""
    loss = jnp.float32(0.0)
    for a, p, n in zip(a_feats, p_feats, n_feats):
        a = a.astype(jnp.float32)
        p = p.astype(jnp.float32)
        n = n.astype(jnp.float32)
        d_ap = jnp.mean(jnp.abs(a - p))
        if not ablation:
            d_an = jnp.mean(jnp.abs(a - n))
            loss = loss + d_ap / (d_an + 1e-7)
        else:
            loss = loss + d_ap
    return loss


if __name__ == "__main__":
    key = jax.random.PRNGKey(0)
    # Small multi-scale "VGG-like" feature pyramid (NCHW), plus:
    #  - one ragged shape (numel not a multiple of 128) to exercise the mask,
    #  - one larger map (rows > TM_MAX) to exercise multi-block accumulation.
    shapes = [
        (2, 4, 16, 16),   # 2048 elems
        (2, 8, 8, 8),     # 1024 elems
        (2, 16, 4, 4),    # 512 elems
        (2, 3, 7, 5),     # 210 elems (ragged tail + masked partial block)
        (2, 32, 64, 64),  # 262144 elems (2 grid blocks at TM=1024)
    ]
    a_feats, p_feats, n_feats = [], [], []
    for s in shapes:
        key, ka, kp, kn = jax.random.split(key, 4)
        a_feats.append(jax.random.normal(ka, s, dtype=jnp.float32))
        p_feats.append(jax.random.normal(kp, s, dtype=jnp.float32))
        n_feats.append(jax.random.normal(kn, s, dtype=jnp.float32))

    loss = l1_contrast_loss(a_feats, p_feats, n_feats)
    loss = jax.block_until_ready(loss)
    ref = l1_contrast_loss_ref(a_feats, p_feats, n_feats)
    assert jnp.allclose(loss, ref, rtol=1e-5, atol=1e-5), (loss, ref)

    # Ablation path (skips the negative stream entirely).
    loss_ab = l1_contrast_loss(a_feats, p_feats, n_feats, ablation=True)
    loss_ab = jax.block_until_ready(loss_ab)
    ref_ab = l1_contrast_loss_ref(a_feats, p_feats, n_feats, ablation=True)
    assert jnp.allclose(loss_ab, ref_ab, rtol=1e-5, atol=1e-5), (loss_ab, ref_ab)

    print("KERNEL_OK")
</pallas_src>

<mosaic_0001>
module attributes {stable_mosaic.version = 11 : i64} {
  func.func @kernel(%arg0: i32, %arg1: memref<16x128xf32, #tpu.memory_space<vmem>>, %arg2: memref<16x128xf32, #tpu.memory_space<vmem>>, %arg3: memref<16x128xf32, #tpu.memory_space<vmem>>, %arg4: memref<2x8x128xf32, #tpu.memory_space<vmem>>) attributes {dimension_semantics = [#tpu.dimension_semantics<arbitrary>], iteration_bounds = array<i64: 1>, scalar_prefetch = 0 : i64, scratch_operands = 0 : i64, tpu.core_type = #tpu.core_type<tc>, window_params = [{transform_indices = @transform_0, window_bounds = array<i64: 16, 128>}, {transform_indices = @transform_1, window_bounds = array<i64: 16, 128>}, {transform_indices = @transform_2, window_bounds = array<i64: 16, 128>}, {pipeline_mode = #tpu.pipeline_mode<synchronous>, transform_indices = @transform_3, window_bounds = array<i64: 2, 8, 128>}]} {
    %c0_i32 = arith.constant 0 : i32
    %0 = arith.cmpi eq, %arg0, %c0_i32 : i32
    %1 = arith.extui %0 : i1 to i32
    %c0_i32_0 = arith.constant 0 : i32
    %2 = arith.cmpi ne, %1, %c0_i32_0 : i32
    scf.if %2 {
      %cst_18 = arith.constant 0.000000e+00 : f32
      %26 = vector.broadcast %cst_18 : f32 to vector<2x8x128xf32>
      %c0_19 = arith.constant 0 : index
      %c0_20 = arith.constant 0 : index
      %c0_21 = arith.constant 0 : index
      %27 = vector.load %arg4[%c0_19, %c0_20, %c0_21] : memref<2x8x128xf32, #tpu.memory_space<vmem>>, vector<2x8x128xf32>
      tpu.vector_store %arg4[%c0_19, %c0_20, %c0_21], %26 {strides = array<i32>} : memref<2x8x128xf32, #tpu.memory_space<vmem>>, vector<2x8x128xf32>,
    } else {
    }
    %c0 = arith.constant 0 : index
    %c0_1 = arith.constant 0 : index
    %3 = vector.load %arg1[%c0, %c0_1] : memref<16x128xf32, #tpu.memory_space<vmem>>, vector<16x128xf32>
    %c0_2 = arith.constant 0 : index
    %c0_3 = arith.constant 0 : index
    %4 = vector.load %arg2[%c0_2, %c0_3] : memref<16x128xf32, #tpu.memory_space<vmem>>, vector<16x128xf32>
    %5 = arith.subf %3, %4 : vector<16x128xf32>
    %6 = math.absf %5 : vector<16x128xf32>
    %c0_4 = arith.constant 0 : index
    %c0_5 = arith.constant 0 : index
    %7 = vector.load %arg3[%c0_4, %c0_5] : memref<16x128xf32, #tpu.memory_space<vmem>>, vector<16x128xf32>
    %8 = arith.subf %3, %7 : vector<16x128xf32>
    %9 = math.absf %8 : vector<16x128xf32>
    %c0_6 = arith.constant 0 : index
    %c0_7 = arith.constant 0 : index
    %c0_8 = arith.constant 0 : index
    %10 = vector.load %arg4[%c0_6, %c0_7, %c0_8] : memref<2x8x128xf32, #tpu.memory_space<vmem>>, vector<1x8x128xf32>
    %11 = vector.shape_cast %10 : vector<1x8x128xf32> to vector<8x128xf32>
    %12 = vector.shape_cast %6 : vector<16x128xf32> to vector<2x8x128xf32>
    %cst = arith.constant dense<0.000000e+00> : vector<8x128xf32>
    %13 = vector.multi_reduction <add>, %12, %cst [0] : vector<2x8x128xf32> to vector<8x128xf32>
    %14 = arith.addf %11, %13 : vector<8x128xf32>
    %c0_9 = arith.constant 0 : index
    %c0_10 = arith.constant 0 : index
    %c0_11 = arith.constant 0 : index
    %15 = vector.load %arg4[%c0_9, %c0_10, %c0_11] : memref<2x8x128xf32, #tpu.memory_space<vmem>>, vector<1x8x128xf32>
    %16 = vector.shape_cast %15 : vector<1x8x128xf32> to vector<8x128xf32>
    %17 = vector.shape_cast %14 : vector<8x128xf32> to vector<1x8x128xf32>
    tpu.vector_store %arg4[%c0_9, %c0_10, %c0_11], %17 {strides = array<i32>} : memref<2x8x128xf32, #tpu.memory_space<vmem>>, vector<1x8x128xf32>,
    %c1 = arith.constant 1 : index
    %c0_12 = arith.constant 0 : index
    %c0_13 = arith.constant 0 : index
    %18 = vector.load %arg4[%c1, %c0_12, %c0_13] : memref<2x8x128xf32, #tpu.memory_space<vmem>>, vector<1x8x128xf32>
    %19 = vector.shape_cast %18 : vector<1x8x128xf32> to vector<8x128xf32>
    %20 = vector.shape_cast %9 : vector<16x128xf32> to vector<2x8x128xf32>
    %cst_14 = arith.constant dense<0.000000e+00> : vector<8x128xf32>
    %21 = vector.multi_reduction <add>, %20, %cst_14 [0] : vector<2x8x128xf32> to vector<8x128xf32>
    %22 = arith.addf %19, %21 : vector<8x128xf32>
    %c1_15 = arith.constant 1 : index
    %c0_16 = arith.constant 0 : index
    %c0_17 = arith.constant 0 : index
    %23 = vector.load %arg4[%c1_15, %c0_16, %c0_17] : memref<2x8x128xf32, #tpu.memory_space<vmem>>, vector<1x8x128xf32>
    %24 = vector.shape_cast %23 : vector<1x8x128xf32> to vector<8x128xf32>
    %25 = vector.shape_cast %22 : vector<8x128xf32> to vector<1x8x128xf32>
    tpu.vector_store %arg4[%c1_15, %c0_16, %c0_17], %25 {strides = array<i32>} : memref<2x8x128xf32, #tpu.memory_space<vmem>>, vector<1x8x128xf32>,
    return
  }
  func.func @transform_0(%arg0: i32) -> (i32, i32) {
    %c0_i32 = arith.constant 0 : i32
    %c0_i32_0 = arith.constant 0 : i32
    return %arg0, %c0_i32 : i32, i32
  }
  func.func @transform_1(%arg0: i32) -> (i32, i32) {
    %c0_i32 = arith.constant 0 : i32
    %c0_i32_0 = arith.constant 0 : i32
    return %arg0, %c0_i32 : i32, i32
  }
  func.func @transform_2(%arg0: i32) -> (i32, i32) {
    %c0_i32 = arith.constant 0 : i32
    %c0_i32_0 = arith.constant 0 : i32
    return %arg0, %c0_i32 : i32, i32
  }
  func.func @transform_3(%arg0: i32) -> (i32, i32, i32) {
    %c0_i32 = arith.constant 0 : i32
    %c0_i32_0 = arith.constant 0 : i32
    %c0_i32_1 = arith.constant 0 : i32
    %c0_i32_2 = arith.constant 0 : i32
    return %c0_i32, %c0_i32_0, %c0_i32_1 : i32, i32, i32
  }
}

</mosaic_0001>

<bundles_post_ra>
// kernel: _pair_sums_impl.1
= control target key start
LH: loop header
LB: loop body
LE: loop exit
PB: predicated region body
PF: predicated region fallthrough
CT: control target
= control target key end

     0   :  { %8 = vsyncpa [#allocation3], 0  ;;  %s220_s0 = inlined_call_operand.hbm [shape: f32[16,128], index: 0, kind: input, shape index: {}]   ;;  %s221_s1 = inlined_call_operand.hbm [shape: f32[16,128], index: 1, kind: input, shape index: {}]   ;;  %s222_s2 = inlined_call_operand.hbm [shape: f32[16,128], index: 2, kind: input, shape index: {}]   ;;  %s223_s3 = inlined_call_operand.vmem [shape: f32[2,8,128], index: 3, kind: output, shape index: {}]  }
   0x1   :  { %9 = vsyncpa [#allocation5], 0  ;;  %s27_s14 = sshll.u32 %s221_s1, 4  ;;  %s180_s15 = smov [#allocation4]   ;;  %s28_s14 = int_to_ptr.hbm [resolvable:$true] %s27_s14 }
   0x2   :  { %s29_s16 = sshll.u32 %s180_s15, 4  ;;  %s14_s19 = sshll.u32 %s220_s0, 4  ;;  %s30_s16 = int_to_ptr.vmem [resolvable:$true] %s29_s16  ;;  %s15_s19 = int_to_ptr.hbm [resolvable:$true] %s14_s19 }
   0x3   :  { %s181_s20 = smov 128   ;;  %s182_s21 = smov 8  }
   0x4   :  { %35 = dma.hbm_to_vmem [thread:$0]  %s28_s14, 256, %s30_s16, [#allocation5], %s181_s20, %s181_s20, %s182_s21  }
   0x5   :  { %s183_s22 = smov [#allocation2]   ;;  %s40_s26 = sshll.u32 %s222_s2, 4  ;;  %s41_s26 = int_to_ptr.hbm [resolvable:$true] %s40_s26 }
   0x6   :  { %s16_s23 = sshll.u32 %s183_s22, 4  ;;  %s184_s1 = smov [#allocation6]   ;;  %s17_s23 = int_to_ptr.vmem [resolvable:$true] %s16_s23 }
   0x7   :  { %22 = dma.hbm_to_vmem [thread:$0]  %s15_s19, 256, %s17_s23, [#allocation3], %s181_s20, %s181_s20, %s182_s21  }
   0x8   :  { %s42_s27 = sshll.u32 %s184_s1, 4  ;;  %s43_s27 = int_to_ptr.vmem [resolvable:$true] %s42_s27 }
   0x9   :  { %48 = dma.hbm_to_vmem [thread:$0]  %s41_s26, 256, %s43_s27, [#allocation5], %s181_s20, %s181_s20, %s182_s21  }
   0xa   :  { %176 = dma.done.wait [#allocation3], 256  }
   0xb   :  { %177 = vsyncadd [#allocation3], 4294967040 }
   0xc   :  { %178 = dma.done.wait [#allocation5], 512  }
   0xd   :  { %179 = vsyncadd [#allocation5], 4294966784  ;;  %v67_v0 = vld [vmem:[#allocation2] sm:$0xff]  ;;  %v68_v1 = vld [vmem:[#allocation2 + $0x8] sm:$0xff] }
   0xe   :  { %v69_v2 = vld [vmem:[#allocation4] sm:$0xff]  ;;  %v70_v3 = vld [vmem:[#allocation4 + $0x8] sm:$0xff]  ;;  %v75_v5 = vld [vmem:[#allocation6] sm:$0xff] }
   0xf   :  { %v71_v4 = vsub.f32 %v67_v0, %v69_v2  ;;  %v76_v6 = vld [vmem:[#allocation6 + $0x8] sm:$0xff]  ;;  %v72_v7 = vsub.f32 %v68_v1, %v70_v3  ;;  %v77_v8 = vsub.f32 %v67_v0, %v75_v5 }
  0x10   :  { %v78_v9 = vsub.f32 %v68_v1, %v76_v6 }
  0x11   :  { %v73_v10 = vand.u32 2147483647, %v71_v4  ;;  %v74_v11 = vand.u32 2147483647, %v72_v7  ;;  %v79_v12 = vand.u32 2147483647, %v77_v8 }
  0x12   :  { %v80_v13 = vand.u32 2147483647, %v78_v9 }
  0x13   :  { %v82_v14 = vadd.f32 %v74_v11, %v73_v10 }
  0x14   :  { %v87_v15 = vadd.f32 %v80_v13, %v79_v12 }
  0x15   :  { %84 = vst [vmem:[%s223_s3] sm:$0xff] %v82_v14 }
  0x16   :  { %97 = vst [vmem:[%s223_s3 + $0x8] sm:$0xff] %v87_v15 }
  0x17   :  { %94 = vsyncpa [#allocation3], 1 }
  0x18   :  { %95 = vsyncpa [#allocation5], 1 }

</bundles_post_ra>
